<compile_context>
chip_gen: v7x
topology: tpu7x:2x2x1
jax: 0.10.0
libtpu: 0.0.40
codegen_flags: <defaults>
</compile_context>

<pallas_src>
import functools

import jax
import jax.numpy as jnp
from jax.experimental import pallas as pl
from jax.experimental.pallas import tpu as pltpu

EPS = 1e-5
STAGE_REPEATS = [3, 7, 3]


def _round_up(x, m):
    return (x + m - 1) // m * m


# ----------------------------- Pallas kernels -----------------------------

def _matmul_bn_kernel(x_ref, w_ref, scale_ref, bias_ref, o_ref, *, relu):
    # bf16 MXU matmul (f32 accumulate) + folded-BN scale/bias (+ReLU) in f32.
    y = jnp.dot(x_ref[...].astype(jnp.bfloat16), w_ref[...],
                preferred_element_type=jnp.float32)
    y = y * scale_ref[...] + bias_ref[...]
    if relu:
        y = jnp.maximum(y, 0.0)
    o_ref[...] = y


def _matmul_bn_add_relu_kernel(x_ref, w_ref, scale_ref, bias_ref, res_ref, o_ref):
    # matmul + folded BN + residual add + ReLU (ShuffleUnit "add" combine).
    y = jnp.dot(x_ref[...].astype(jnp.bfloat16), w_ref[...],
                preferred_element_type=jnp.float32)
    y = y * scale_ref[...] + bias_ref[...] + res_ref[...]
    o_ref[...] = jnp.maximum(y, 0.0)


def _win3x3_kernel(*args, stride, op, relu):
    # Row-wise 3x3 window kernel (depthwise conv / max pool / avg pool).
    # stride 1: refs = 3 halo rows (W+2, C) of the padded input.
    # stride 2: refs = even/odd column splits of 3 halo rows (W//2+1, C),
    #           so stride-2 output columns are direct static slices.
    nrow = 3 if stride == 1 else 6
    rows = args[:nrow]
    if op == "dw":
        w_ref, s_ref, b_ref, o_ref = args[nrow:]
    else:
        (o_ref,) = args[nrow:]
    wo = o_ref.shape[0]                       # output block is (Wo, C)

    def tap(i, j):
        if stride == 1:
            return rows[i][j:j + wo, :]
        e, o = rows[2 * i], rows[2 * i + 1]
        if j == 0:
            return e[0:wo, :]
        if j == 1:
            return o[0:wo, :]
        return e[1:wo + 1, :]

    acc = None
    for i in range(3):
        for j in range(3):
            t = tap(i, j)
            if op == "dw":
                t = t * w_ref[3 * i + j]       # (1, C) per-channel weight
            if acc is None:
                acc = t
            elif op == "max":
                acc = jnp.maximum(acc, t)
            else:
                acc = acc + t
    if op == "dw":
        acc = acc * s_ref[...] + b_ref[...]    # folded BN
    elif op == "avg":
        acc = acc * (1.0 / 9.0)                # count_include_pad=True (PyTorch)
    if relu:
        acc = jnp.maximum(acc, 0.0)
    o_ref[...] = acc


def _head_kernel(x_ref, w_ref, b_ref, o_ref):
    # Global average pool + fully-connected + softmax, all in one kernel.
    g = jnp.mean(x_ref[...], axis=1)                                   # (N, C)
    logits = jnp.dot(g, w_ref[...], preferred_element_type=jnp.float32) + b_ref[...]
    m = jnp.max(logits, axis=1, keepdims=True)
    e = jnp.exp(logits - m)
    o_ref[...] = e / jnp.sum(e, axis=1, keepdims=True)


# ----------------------------- kernel wrappers -----------------------------

def matmul_bn(x2d, w, scale, bias, relu=False, residual=None):
    """(P, Cin) @ (Cin, Cout) + folded BN (+residual / ReLU), row-tiled."""
    P, Cin = x2d.shape
    Cout = w.shape[1]
    # Large lane-dense row tiles; bounded so double-buffered blocks fit the
    # scoped-VMEM budget across v5e/v6e/v7x.  Never fall back to tile=P for
    # large P; small P is rounded up to a multiple of 8 and padded.
    tile = 512 if max(Cin, Cout) <= 1024 else 256
    if P < tile:
        tile = _round_up(P, 8)
    P_pad = _round_up(P, tile)
    pad = P_pad - P
    if pad:
        x2d = jnp.pad(x2d, ((0, pad), (0, 0)))
        if residual is not None:
            residual = jnp.pad(residual, ((0, pad), (0, 0)))
    grid = (P_pad // tile,)

    x_spec = pl.BlockSpec((tile, Cin), lambda i: (i, 0))
    w_spec = pl.BlockSpec((Cin, Cout), lambda i: (0, 0))
    v_spec = pl.BlockSpec((1, Cout), lambda i: (0, 0))
    o_spec = pl.BlockSpec((tile, Cout), lambda i: (i, 0))
    out_shape = jax.ShapeDtypeStruct((P_pad, Cout), jnp.float32)
    scale = scale.reshape(1, Cout).astype(jnp.float32)
    bias = bias.reshape(1, Cout).astype(jnp.float32)
    cparams = pltpu.CompilerParams(
        dimension_semantics=("parallel",),
        vmem_limit_bytes=32 * 1024 * 1024)

    if residual is None:
        out = pl.pallas_call(
            functools.partial(_matmul_bn_kernel, relu=relu),
            grid=grid,
            in_specs=[x_spec, w_spec, v_spec, v_spec],
            out_specs=o_spec,
            out_shape=out_shape,
            compiler_params=cparams,
        )(x2d, w, scale, bias)
    else:
        r_spec = pl.BlockSpec((tile, Cout), lambda i: (i, 0))
        out = pl.pallas_call(
            _matmul_bn_add_relu_kernel,
            grid=grid,
            in_specs=[x_spec, w_spec, v_spec, v_spec, r_spec],
            out_specs=o_spec,
            out_shape=out_shape,
            compiler_params=cparams,
        )(x2d, w, scale, bias, residual)
    return out[:P] if pad else out


def _win3x3(x, stride, op, dw_w=None, scale=None, bias=None, relu=False):
    """3x3 window op, pad=1, stride 1|2, gridded over (N, out_row).

    Each grid step reads 3 halo rows of the padded input (even/odd column
    splits for stride 2) and writes one lane-dense output row; taps are formed
    in VMEM and stride-2 outputs are evaluated directly.
    """
    N, H, W, C = x.shape
    pad_val = -jnp.inf if op == "max" else 0.0
    xp = jnp.pad(x, ((0, 0), (1, 1), (1, 1), (0, 0)), constant_values=pad_val)

    if stride == 1:
        Ho, Wo, Wr = H, W, W + 2
        row_inputs = [xp, xp, xp]
        row_specs = [
            pl.BlockSpec((None, None, Wr, C), lambda n, r, k=k: (n, r + k, 0, 0))
            for k in range(3)
        ]
    else:
        assert H % 2 == 0 and W % 2 == 0, "stride-2 3x3 expects even H, W"
        Ho, Wo, Wr = H // 2, W // 2, W // 2 + 1
        xe = xp[:, :, 0::2, :]            # even padded columns (N, H+2, Wr, C)
        xo = xp[:, :, 1::2, :]            # odd  padded columns (N, H+2, Wr, C)
        row_inputs, row_specs = [], []
        for k in range(3):
            for src in (xe, xo):
                row_inputs.append(src)
                row_specs.append(pl.BlockSpec(
                    (None, None, Wr, C), lambda n, r, k=k: (n, 2 * r + k, 0, 0)))

    extra_inputs, extra_specs = [], []
    if op == "dw":
        extra_inputs = [dw_w.reshape(9, 1, C).astype(jnp.float32),
                        scale.reshape(1, C).astype(jnp.float32),
                        bias.reshape(1, C).astype(jnp.float32)]
        extra_specs = [pl.BlockSpec((9, 1, C), lambda n, r: (0, 0, 0)),
                       pl.BlockSpec((1, C), lambda n, r: (0, 0)),
                       pl.BlockSpec((1, C), lambda n, r: (0, 0))]

    return pl.pallas_call(
        functools.partial(_win3x3_kernel, stride=stride, op=op, relu=relu),
        grid=(N, Ho),
        in_specs=row_specs + extra_specs,
        out_specs=pl.BlockSpec((None, None, Wo, C), lambda n, r: (n, r, 0, 0)),
        out_shape=jax.ShapeDtypeStruct((N, Ho, Wo, C), jnp.float32),
        compiler_params=pltpu.CompilerParams(
            dimension_semantics=("parallel", "parallel")),
    )(*(row_inputs + extra_inputs))


def depthwise3x3_bn(x, dw_w, scale, bias, stride):
    return _win3x3(x, stride, "dw", dw_w=dw_w, scale=scale, bias=bias)


def maxpool3x3_s2(x):
    return _win3x3(x, 2, "max")


def avgpool3x3_s2(x, relu=False):
    return _win3x3(x, 2, "avg", relu=relu)


def grouped_conv1x1_bn(x, w, scale, bias, relu=False, residual=None):
    N, H, W, Cin = x.shape
    Cout = w.shape[1]
    x2d = x.reshape(N * H * W, Cin)
    r2d = residual.reshape(N * H * W, Cout) if residual is not None else None
    out = matmul_bn(x2d, w, scale, bias, relu=relu, residual=r2d)
    return out.reshape(N, H, W, Cout)


def conv1_forward(x, w32, scale, bias):
    """First 3x3 conv (stride 2, pad 1), 3->24: stride-2-only im2col with Cin
    padded 27->32, then the fused BN+ReLU Pallas matmul."""
    N, H, W, C = x.shape
    Ho, Wo = H // 2, W // 2
    xp = jnp.pad(x, ((0, 0), (1, 1), (1, 1), (0, 0)))
    cols = jnp.concatenate(
        [xp[:, i:i + 2 * Ho:2, j:j + 2 * Wo:2, :]
         for i in range(3) for j in range(3)], axis=-1)          # (N, Ho, Wo, 27)
    cols = jnp.pad(cols, ((0, 0), (0, 0), (0, 0), (0, 32 - 9 * C)))
    out = matmul_bn(cols.reshape(N * Ho * Wo, 32), w32, scale, bias, relu=True)
    return out.reshape(N, Ho, Wo, -1)


# ----------------------------- parameter setup -----------------------------

def _kaiming_normal(key, shape, fan_out):
    std = (2.0 / fan_out) ** 0.5
    return std * jax.random.normal(key, shape, dtype=jnp.float32)


def _block_diag_1x1(key, cin, cout, groups):
    cin_g, cout_g = cin // groups, cout // groups
    keys = jax.random.split(key, groups)
    w = jnp.zeros((cin, cout), jnp.float32)
    for g in range(groups):
        wg = _kaiming_normal(keys[g], (cin_g, cout_g), fan_out=cout)
        w = w.at[g * cin_g:(g + 1) * cin_g, g * cout_g:(g + 1) * cout_g].set(wg)
    return w


def _bn_params(c):
    # Inference-mode BatchNorm folded to scale/bias: gamma=1, beta=0,
    # running_mean=0, running_var=1 (matches init_weights + fresh buffers).
    scale = jnp.full((c,), 1.0 / (1.0 + EPS) ** 0.5, jnp.float32)
    bias = jnp.zeros((c,), jnp.float32)
    return scale, bias


def _shuffle_perm(c, groups):
    # out[..., k] = x[..., perm[k]] for channel_shuffle(x, groups)
    return jnp.arange(c).reshape(groups, c // groups).T.reshape(-1)


def init_shuffle_unit(key, in_planes, out_planes, combine, groups, groups_conv):
    planes = in_planes // 4
    g1 = groups if groups_conv else 1
    out_eff = out_planes - in_planes if combine == "concat" else out_planes
    k1, k2, k3 = jax.random.split(key, 3)
    w1 = _block_diag_1x1(k1, in_planes, planes, g1)
    s1, b1 = _bn_params(planes)
    # Fold channel_shuffle into conv1's output channels / bn1 (the channel
    # permutation commutes through the per-channel depthwise conv + BN),
    # removing the activation transpose entirely.
    perm = _shuffle_perm(planes, groups)
    w1 = w1[:, perm]
    s1, b1 = s1[perm], b1[perm]
    return {
        "w1": w1.astype(jnp.bfloat16),
        "bn1": (s1, b1),
        "dw_w": _kaiming_normal(k2, (9, planes), fan_out=planes * 9),
        "bn2": _bn_params(planes),
        "w2": _block_diag_1x1(k3, planes, out_eff, groups).astype(jnp.bfloat16),
        "bn3": _bn_params(out_eff),
        "combine": combine,
        "stride": 2 if combine == "concat" else 1,
    }


def _stage_out_channels(groups):
    return {1: [-1, 24, 144, 288, 576],
            2: [-1, 24, 200, 400, 800],
            3: [-1, 24, 240, 480, 960],
            4: [-1, 24, 272, 544, 1088],
            8: [-1, 24, 384, 768, 1536]}[groups]


def init_shufflenet(key, groups, num_classes):
    soc = _stage_out_channels(groups)
    keys = jax.random.split(key, 8)
    w27 = _kaiming_normal(keys[0], (27, soc[1]), fan_out=soc[1] * 9)
    conv1_w = jnp.zeros((32, soc[1]), jnp.float32).at[:27].set(w27)   # Cin pad
    params = {
        "conv1_w": conv1_w.astype(jnp.bfloat16),
        "bn1": _bn_params(soc[1]),
    }
    stages = []
    for si, stage_index in enumerate([2, 3, 4]):
        ukeys = jax.random.split(keys[1 + si], STAGE_REPEATS[stage_index - 2] + 1)
        units = [init_shuffle_unit(ukeys[0], soc[stage_index - 1], soc[stage_index],
                                   "concat", groups, groups_conv=stage_index > 2)]
        for r in range(STAGE_REPEATS[stage_index - 2]):
            units.append(init_shuffle_unit(ukeys[r + 1], soc[stage_index],
                                           soc[stage_index], "add", groups, True))
        stages.append(units)
    params["stages"] = stages
    params["fc_w"] = 0.001 * jax.random.normal(keys[6], (soc[-1], num_classes),
                                               dtype=jnp.float32)
    params["fc_b"] = jnp.zeros((1, num_classes), jnp.float32)
    return params


# ------------------------------- forward pass -------------------------------

def shuffle_unit_forward(x, p, groups):
    # channel_shuffle already folded into w1/bn1 at init time.
    out = grouped_conv1x1_bn(x, p["w1"], *p["bn1"], relu=True)
    out = depthwise3x3_bn(out, p["dw_w"], *p["bn2"], stride=p["stride"])
    if p["combine"] == "add":
        # conv2 + bn3 + residual-add + relu fused in one Pallas matmul kernel.
        return grouped_conv1x1_bn(out, p["w2"], *p["bn3"], residual=x)
    # concat branch: relu(cat(a, b)) == cat(relu(a), relu(b))
    out = grouped_conv1x1_bn(out, p["w2"], *p["bn3"], relu=True)
    xa = avgpool3x3_s2(x, relu=True)
    return jnp.concatenate([xa, out], axis=-1)


def shufflenet_forward(params, x_nchw, groups):
    x = jnp.transpose(x_nchw, (0, 2, 3, 1)).astype(jnp.float32)   # NCHW -> NHWC
    x = conv1_forward(x, params["conv1_w"], *params["bn1"])
    x = maxpool3x3_s2(x)
    for units in params["stages"]:
        for p in units:
            x = shuffle_unit_forward(x, p, groups)
    N, H, W, C = x.shape
    x3 = x.reshape(N, H * W, C)
    num_classes = params["fc_w"].shape[1]
    return pl.pallas_call(
        _head_kernel,
        out_shape=jax.ShapeDtypeStruct((N, num_classes), jnp.float32),
    )(x3, params["fc_w"], params["fc_b"])


# ----------------------------------- main -----------------------------------

if __name__ == "__main__":
    key = jax.random.PRNGKey(0)
    pkey, xkey = jax.random.split(key)

    groups = 3
    num_classes = 10        # small head; module default is 1000
    params = init_shufflenet(pkey, groups, num_classes)

    # NCHW input like the PyTorch module; 32x32 keeps every stage non-empty.
    x = jax.random.normal(xkey, (2, 3, 32, 32), dtype=jnp.float32)

    out = shufflenet_forward(params, x, groups)
    out = jax.block_until_ready(out)

    assert out.shape == (2, num_classes)
    assert bool(jnp.all(jnp.isfinite(out)))
    # softmax rows sum to ~1 (PyTorch forward ends with F.softmax)
    assert bool(jnp.allclose(jnp.sum(out, axis=1), 1.0, atol=1e-4))
    print("KERNEL_OK")
</pallas_src>

<mosaic_0001>
module attributes {stable_mosaic.version = 11 : i64} {
  func.func @_matmul_bn_kernel(%arg0: i32, %arg1: memref<512x32xf32, #tpu.memory_space<vmem>>, %arg2: memref<32x24xbf16, #tpu.memory_space<vmem>>, %arg3: memref<1x24xf32, #tpu.memory_space<vmem>>, %arg4: memref<1x24xf32, #tpu.memory_space<vmem>>, %arg5: memref<512x24xf32, #tpu.memory_space<vmem>>) attributes {dimension_semantics = [#tpu.dimension_semantics<parallel>], iteration_bounds = array<i64: 1>, scalar_prefetch = 0 : i64, scratch_operands = 0 : i64, tpu.core_type = #tpu.core_type<tc>, window_params = [{transform_indices = @transform_0, window_bounds = array<i64: 512, 32>}, {pipeline_mode = #tpu.pipeline_mode<synchronous>, transform_indices = @transform_1, window_bounds = array<i64: 32, 24>}, {pipeline_mode = #tpu.pipeline_mode<synchronous>, transform_indices = @transform_2, window_bounds = array<i64: 1, 24>}, {pipeline_mode = #tpu.pipeline_mode<synchronous>, transform_indices = @transform_3, window_bounds = array<i64: 1, 24>}, {transform_indices = @transform_4, window_bounds = array<i64: 512, 24>}]} {
    %c0 = arith.constant 0 : index
    %c0_0 = arith.constant 0 : index
    %0 = vector.load %arg1[%c0, %c0_0] : memref<512x32xf32, #tpu.memory_space<vmem>>, vector<512x32xf32>
    %1 = arith.truncf %0 : vector<512x32xf32> to vector<512x32xbf16>
    %c0_1 = arith.constant 0 : index
    %c0_2 = arith.constant 0 : index
    %2 = vector.load %arg2[%c0_1, %c0_2] : memref<32x24xbf16, #tpu.memory_space<vmem>>, vector<32x24xbf16>
    %cst = arith.constant dense<0.000000e+00> : vector<512x24xf32>
    %3 = tpu.matmul %1, %2, %cst {dimension_numbers = #tpu.dot_dimension_numbers<[1], [0], [0], [1], [0, 0, 1, 1], [], []>} : vector<512x32xbf16>, vector<32x24xbf16>, vector<512x24xf32> -> vector<512x24xf32>
    %c0_3 = arith.constant 0 : index
    %c0_4 = arith.constant 0 : index
    %4 = vector.load %arg3[%c0_3, %c0_4] : memref<1x24xf32, #tpu.memory_space<vmem>>, vector<1x24xf32>
    %5 = vector.broadcast %4 : vector<1x24xf32> to vector<512x24xf32>
    %6 = arith.mulf %3, %5 : vector<512x24xf32>
    %c0_5 = arith.constant 0 : index
    %c0_6 = arith.constant 0 : index
    %7 = vector.load %arg4[%c0_5, %c0_6] : memref<1x24xf32, #tpu.memory_space<vmem>>, vector<1x24xf32>
    %8 = vector.broadcast %7 : vector<1x24xf32> to vector<512x24xf32>
    %9 = arith.addf %6, %8 : vector<512x24xf32>
    %cst_7 = arith.constant 0.000000e+00 : f32
    %10 = vector.broadcast %cst_7 : f32 to vector<512x24xf32>
    %11 = arith.maximumf %9, %10 : vector<512x24xf32>
    %c0_8 = arith.constant 0 : index
    %c0_9 = arith.constant 0 : index
    %12 = vector.load %arg5[%c0_8, %c0_9] : memref<512x24xf32, #tpu.memory_space<vmem>>, vector<512x24xf32>
    tpu.vector_store %arg5[%c0_8, %c0_9], %11 {strides = array<i32>} : memref<512x24xf32, #tpu.memory_space<vmem>>, vector<512x24xf32>,
    return
  }
  func.func @transform_0(%arg0: i32) -> (i32, i32) {
    %c0_i32 = arith.constant 0 : i32
    %c0_i32_0 = arith.constant 0 : i32
    return %arg0, %c0_i32 : i32, i32
  }
  func.func @transform_1(%arg0: i32) -> (i32, i32) {
    %c0_i32 = arith.constant 0 : i32
    %c0_i32_0 = arith.constant 0 : i32
    %c0_i32_1 = arith.constant 0 : i32
    return %c0_i32, %c0_i32_0 : i32, i32
  }
  func.func @transform_2(%arg0: i32) -> (i32, i32) {
    %c0_i32 = arith.constant 0 : i32
    %c0_i32_0 = arith.constant 0 : i32
    %c0_i32_1 = arith.constant 0 : i32
    return %c0_i32, %c0_i32_0 : i32, i32
  }
  func.func @transform_3(%arg0: i32) -> (i32, i32) {
    %c0_i32 = arith.constant 0 : i32
    %c0_i32_0 = arith.constant 0 : i32
    %c0_i32_1 = arith.constant 0 : i32
    return %c0_i32, %c0_i32_0 : i32, i32
  }
  func.func @transform_4(%arg0: i32) -> (i32, i32) {
    %c0_i32 = arith.constant 0 : i32
    %c0_i32_0 = arith.constant 0 : i32
    return %arg0, %c0_i32 : i32, i32
  }
}

</mosaic_0001>

<bundles_post_ra>
// kernel: tpu_custom_call.1
= control target key start
LH: loop header
LB: loop body
LE: loop exit
PB: predicated region body
PF: predicated region fallthrough
CT: control target
= control target key end

     0   :  { %vm130_vm0 = vcmask 261120   ;;  %vm722_vm1 = vcmask 195584   ;;  %s1584_s1 = inlined_call_operand.vmem [shape: bf16[32,24], index: 1, kind: input, shape index: {}]   ;;  %s1585_s0 = inlined_call_operand.vmem [shape: f32[512,32], index: 0, kind: input, shape index: {}]   ;;  %s1586_s2 = inlined_call_operand.vmem [shape: f32[1,24], index: 2, kind: input, shape index: {}]   ;;  %s1587_s3 = inlined_call_operand.vmem [shape: f32[1,24], index: 3, kind: input, shape index: {}]   ;;  %s1588_s4 = inlined_call_operand.vmem [shape: f32[512,24], index: 4, kind: output, shape index: {}]  }
   0x1   :  { %v933_v0 = vld [vmem:[%s1584_s1] sm:$0xff]   ;;  %v934_v1 = vld [vmem:[%s1584_s1 + $0x8] sm:$0xff]   ;;  %v20_v7 = vld [vmem:[%s1585_s0 + $0x10] sm:$0xff] }
   0x2   :  { %861 = vmatprep.subr.bf16.mxu0 %v933_v0  ;;  %929 = vmatprep.subr.bf16.mxu1 %v933_v0  ;;  %v18_v2 = vld [vmem:[%s1585_s0] sm:$0xff]  ;;  %v19_v3 = vld [vmem:[%s1585_s0 + $0x8] sm:$0xff]  ;;  %v21_v8 = vld [vmem:[%s1585_s0 + $0x18] sm:$0xff] }
   0x3   :  { %v50_v4 = vld [vmem:[%s1585_s0 + $0x100] sm:$0xff]  ;;  %862 = vmatpush3.bf16.msra.mxu0 %v933_v0  ;;  %931 = vmatpush3.bf16.msra.mxu1 %v933_v0  ;;  %v82_v5 = vpack.c.bf16 %v19_v3, %v18_v2  ;;  %v51_v6 = vld [vmem:[%s1585_s0 + $0x108] sm:$0xff]  ;;  %v52_v10 = vld [vmem:[%s1585_s0 + $0x110] sm:$0xff]  ;;  %v83_v16 = vpack.c.bf16 %v21_v8, %v20_v7 }
   0x4   :  { %863 = vmatprep.subr.bf16.mxu0 %v934_v1  ;;  %930 = vmatprep.subr.bf16.mxu1 %v934_v1  ;;  %v98_v9 = vpack.c.bf16 %v51_v6, %v50_v4  ;;  %v53_v11 = vld [vmem:[%s1585_s0 + $0x118] sm:$0xff]  ;;  %v22_v12 = vld [vmem:[%s1585_s0 + $0x20] sm:$0xff]  ;;  %v23_v13 = vld [vmem:[%s1585_s0 + $0x28] sm:$0xff] }
   0x5   :  { %865 = vmatprep.mubr.msk.bf16.mxu0 %vm130_vm0, %v82_v5  ;;  %v54_v14 = vld [vmem:[%s1585_s0 + $0x120] sm:$0xff]  ;;  %v55_v15 = vld [vmem:[%s1585_s0 + $0x128] sm:$0xff]  ;;  %v99_v17 = vpack.c.bf16 %v53_v11, %v52_v10  ;;  %v84_v18 = vpack.c.bf16 %v23_v13, %v22_v12  ;;  %v24_v20 = vld [vmem:[%s1585_s0 + $0x30] sm:$0xff] }
   0x6   :  { %897 = vmatprep.mubr.msk.bf16.mxu1 %vm130_vm0, %v98_v9  ;;  %v100_v19 = vpack.c.bf16 %v55_v15, %v54_v14  ;;  %v25_v21 = vld [vmem:[%s1585_s0 + $0x38] sm:$0xff]  ;;  %v56_v22 = vld [vmem:[%s1585_s0 + $0x130] sm:$0xff]  ;;  %v26_v24 = vld [vmem:[%s1585_s0 + $0x40] sm:$0xff] }
   0x7   :  { %864 = vmatpush3.bf16.msra.mxu0 %v934_v1  ;;  %932 = vmatpush3.bf16.msra.mxu1 %v934_v1  ;;  %v57_v23 = vld [vmem:[%s1585_s0 + $0x138] sm:$0xff]  ;;  %v27_v25 = vld [vmem:[%s1585_s0 + $0x48] sm:$0xff]  ;;  %v58_v26 = vld [vmem:[%s1585_s0 + $0x140] sm:$0xff]  ;;  %v85_v28 = vpack.c.bf16 %v25_v21, %v24_v20 }
   0x8   :  { %v59_v27 = vld [vmem:[%s1585_s0 + $0x148] sm:$0xff]  ;;  %v101_v29 = vpack.c.bf16 %v57_v23, %v56_v22  ;;  %v86_v30 = vpack.c.bf16 %v27_v25, %v26_v24  ;;  %v28_v32 = vld [vmem:[%s1585_s0 + $0x50] sm:$0xff]  ;;  %v29_v33 = vld [vmem:[%s1585_s0 + $0x58] sm:$0xff] }
   0x9   :  { %v102_v31 = vpack.c.bf16 %v59_v27, %v58_v26  ;;  %v60_v34 = vld [vmem:[%s1585_s0 + $0x150] sm:$0xff]  ;;  %v61_v35 = vld [vmem:[%s1585_s0 + $0x158] sm:$0xff]  ;;  %v30_v36 = vld [vmem:[%s1585_s0 + $0x60] sm:$0xff]  ;;  %v87_v40 = vpack.c.bf16 %v29_v33, %v28_v32 }
   0xa   :  { %866 = vmatmul.mubr.msk.bf16.vlgmr.msra.gmra.mrb[0].mxu0 %vm130_vm0, %v83_v16  ;;  %898 = vmatmul.mubr.msk.bf16.vlgmr.msra.gmra.mrb[0].mxu1 %vm130_vm0, %v99_v17  ;;  %v31_v37 = vld [vmem:[%s1585_s0 + $0x68] sm:$0xff]  ;;  %v62_v38 = vld [vmem:[%s1585_s0 + $0x160] sm:$0xff]  ;;  %v103_v41 = vpack.c.bf16 %v61_v35, %v60_v34  ;;  %v32_v44 = vld [vmem:[%s1585_s0 + $0x70] sm:$0xff] }
   0xb   :  { %869 = vmatprep.mubr.msk.bf16.mxu0 %vm130_vm0, %v84_v18  ;;  %901 = vmatprep.mubr.msk.bf16.mxu1 %vm130_vm0, %v100_v19  ;;  %v63_v39 = vld [vmem:[%s1585_s0 + $0x168] sm:$0xff]  ;;  %v88_v42 = vpack.c.bf16 %v31_v37, %v30_v36  ;;  %v33_v45 = vld [vmem:[%s1585_s0 + $0x78] sm:$0xff]  ;;  %v64_v46 = vld [vmem:[%s1585_s0 + $0x170] sm:$0xff] }
   0xc   :  { %v104_v43 = vpack.c.bf16 %v63_v39, %v62_v38  ;;  %v65_v47 = vld [vmem:[%s1585_s0 + $0x178] sm:$0xff]  ;;  %v34_v48 = vld [vmem:[%s1585_s0 + $0x80] sm:$0xff]  ;;  %v35_v49 = vld [vmem:[%s1585_s0 + $0x88] sm:$0xff]  ;;  %v89_v52 = vpack.c.bf16 %v33_v45, %v32_v44 }
   0xd   :  { %v66_v50 = vld [vmem:[%s1585_s0 + $0x180] sm:$0xff]  ;;  %v67_v51 = vld [vmem:[%s1585_s0 + $0x188] sm:$0xff]  ;;  %v105_v53 = vpack.c.bf16 %v65_v47, %v64_v46  ;;  %v90_v54 = vpack.c.bf16 %v35_v49, %v34_v48  ;;  %v36_v56 = vld [vmem:[%s1585_s0 + $0x90] sm:$0xff] }
   0xe   :  { %v106_v55 = vpack.c.bf16 %v67_v51, %v66_v50  ;;  %v37_v57 = vld [vmem:[%s1585_s0 + $0x98] sm:$0xff]  ;;  %v68_v58 = vld [vmem:[%s1585_s0 + $0x190] sm:$0xff]  ;;  %v38_v60 = vld [vmem:[%s1585_s0 + $0xa0] sm:$0xff] }
   0xf   :  { %v69_v59 = vld [vmem:[%s1585_s0 + $0x198] sm:$0xff]  ;;  %v39_v61 = vld [vmem:[%s1585_s0 + $0xa8] sm:$0xff]  ;;  %v70_v62 = vld [vmem:[%s1585_s0 + $0x1a0] sm:$0xff]  ;;  %v91_v0 = vpack.c.bf16 %v37_v57, %v36_v56 }
  0x10   :  { %v71_v63 = vld [vmem:[%s1585_s0 + $0x1a8] sm:$0xff]  ;;  %v107_v1 = vpack.c.bf16 %v69_v59, %v68_v58  ;;  %v92_v2 = vpack.c.bf16 %v39_v61, %v38_v60  ;;  %v40_v4 = vld [vmem:[%s1585_s0 + $0xb0] sm:$0xff]  ;;  %v41_v5 = vld [vmem:[%s1585_s0 + $0xb8] sm:$0xff] }
  0x11   :  { %v108_v3 = vpack.c.bf16 %v71_v63, %v70_v62  ;;  %v72_v6 = vld [vmem:[%s1585_s0 + $0x1b0] sm:$0xff]  ;;  %v73_v7 = vld [vmem:[%s1585_s0 + $0x1b8] sm:$0xff]  ;;  %v42_v8 = vld [vmem:[%s1585_s0 + $0xc0] sm:$0xff]  ;;  %v93_v12 = vpack.c.bf16 %v41_v5, %v40_v4 }
  0x12   :  { %870 = vmatmul.mubr.msk.bf16.gmra.mrb[4].mxu0 %vm130_vm0, %v85_v28  ;;  %902 = vmatmul.mubr.msk.bf16.gmra.mrb[4].mxu1 %vm130_vm0, %v101_v29  ;;  %v43_v9 = vld [vmem:[%s1585_s0 + $0xc8] sm:$0xff]  ;;  %v74_v10 = vld [vmem:[%s1585_s0 + $0x1c0] sm:$0xff]  ;;  %v109_v13 = vpack.c.bf16 %v73_v7, %v72_v6  ;;  %v44_v16 = vld [vmem:[%s1585_s0 + $0xd0] sm:$0xff] }
  0x13   :  { %873 = vmatprep.mubr.msk.bf16.mxu0 %vm130_vm0, %v86_v30  ;;  %905 = vmatprep.mubr.msk.bf16.mxu1 %vm130_vm0, %v102_v31  ;;  %v75_v11 = vld [vmem:[%s1585_s0 + $0x1c8] sm:$0xff]  ;;  %v94_v14 = vpack.c.bf16 %v43_v9, %v42_v8  ;;  %v45_v17 = vld [vmem:[%s1585_s0 + $0xd8] sm:$0xff]  ;;  %v76_v18 = vld [vmem:[%s1585_s0 + $0x1d0] sm:$0xff] }
  0x14   :  { %v110_v15 = vpack.c.bf16 %v75_v11, %v74_v10  ;;  %v77_v19 = vld [vmem:[%s1585_s0 + $0x1d8] sm:$0xff]  ;;  %v46_v20 = vld [vmem:[%s1585_s0 + $0xe0] sm:$0xff]  ;;  %v47_v21 = vld [vmem:[%s1585_s0 + $0xe8] sm:$0xff]  ;;  %v95_v24 = vpack.c.bf16 %v45_v17, %v44_v16 }
  0x15   :  { %v78_v22 = vld [vmem:[%s1585_s0 + $0x1e0] sm:$0xff]  ;;  %v79_v23 = vld [vmem:[%s1585_s0 + $0x1e8] sm:$0xff]  ;;  %v111_v25 = vpack.c.bf16 %v77_v19, %v76_v18  ;;  %v96_v26 = vpack.c.bf16 %v47_v21, %v46_v20  ;;  %v48_v28 = vld [vmem:[%s1585_s0 + $0xf0] sm:$0xff] }
  0x16   :  { %v112_v27 = vpack.c.bf16 %v79_v23, %v78_v22  ;;  %v49_v29 = vld [vmem:[%s1585_s0 + $0xf8] sm:$0xff]  ;;  %v80_v30 = vld [vmem:[%s1585_s0 + $0x1f0] sm:$0xff]  ;;  %v1193_v34 = vld [vmem:[%s1586_s2] ss:$0 sm:$0xff] }
  0x17   :  { %v81_v31 = vld [vmem:[%s1585_s0 + $0x1f8] sm:$0xff]  ;;  %v97_v32 = vpack.c.bf16 %v49_v29, %v48_v28  ;;  %v1198_v36 = vld [vmem:[%s1587_s3] ss:$0 sm:$0xff] }
  0x18   :  { %v113_v33 = vpack.c.bf16 %v81_v31, %v80_v30 }
  0x1a   :  { %874 = vmatmul.mubr.msk.bf16.gmra.mrb[8].mxu0 %vm130_vm0, %v87_v40  ;;  %906 = vmatmul.mubr.msk.bf16.gmra.mrb[8].mxu1 %vm130_vm0, %v103_v41 }
  0x1b   :  { %877 = vmatprep.mubr.msk.bf16.mxu0 %vm130_vm0, %v88_v42  ;;  %909 = vmatprep.mubr.msk.bf16.mxu1 %vm130_vm0, %v104_v43 }
  0x22   :  { %878 = vmatmul.mubr.msk.bf16.gmra.mrb[12].mxu0 %vm130_vm0, %v89_v52  ;;  %910 = vmatmul.mubr.msk.bf16.gmra.mrb[12].mxu1 %vm130_vm0, %v105_v53 }
  0x23   :  { %881 = vmatprep.mubr.msk.bf16.mxu0 %vm130_vm0, %v90_v54  ;;  %913 = vmatprep.mubr.msk.bf16.mxu1 %vm130_vm0, %v106_v55 }
  0x2a   :  { %882 = vmatmul.mubr.msk.bf16.gmra.mrb[16].mxu0 %vm130_vm0, %v91_v0  ;;  %914 = vmatmul.mubr.msk.bf16.gmra.mrb[16].mxu1 %vm130_vm0, %v107_v1 }
  0x2b   :  { %885 = vmatprep.mubr.msk.bf16.mxu0 %vm130_vm0, %v92_v2  ;;  %917 = vmatprep.mubr.msk.bf16.mxu1 %vm130_vm0, %v108_v3 }
  0x32   :  { %886 = vmatmul.mubr.msk.bf16.gmra.mrb[20].mxu0 %vm130_vm0, %v93_v12  ;;  %918 = vmatmul.mubr.msk.bf16.gmra.mrb[20].mxu1 %vm130_vm0, %v109_v13 }
  0x33   :  { %889 = vmatprep.mubr.msk.bf16.mxu0 %vm130_vm0, %v94_v14  ;;  %921 = vmatprep.mubr.msk.bf16.mxu1 %vm130_vm0, %v110_v15 }
  0x3a   :  { %890 = vmatmul.mubr.msk.bf16.gmra.mrb[24].mxu0 %vm130_vm0, %v95_v24  ;;  %922 = vmatmul.mubr.msk.bf16.gmra.mrb[24].mxu1 %vm130_vm0, %v111_v25 }
  0x3b   :  { %893 = vmatprep.mubr.msk.bf16.mxu0 %vm130_vm0, %v96_v26  ;;  %925 = vmatprep.mubr.msk.bf16.mxu1 %vm130_vm0, %v112_v27 }
  0x42   :  { %894 = vmatmul.mubr.msk.bf16.gmra.mrb[28].mxu0 %vm130_vm0, %v97_v32  ;;  %926 = vmatmul.mubr.msk.bf16.gmra.mrb[28].mxu1 %vm130_vm0, %v113_v33 }
  0xdd   :  { %v867_v35 = vpop.f32.mrb[0].mxu0  ;;  %v899_v37 = vpop.f32.mrb[0].mxu1 }
  0xde   :  { %v525_v38 = vmul.f32 %v867_v35, %v1193_v34  ;;  %v557_v39 = vmul.f32 %v899_v37, %v1193_v34  ;;  %v261_v40 = vpop.f32.mrb[1].mxu0  ;;  %v389_v41 = vpop.f32.mrb[1].mxu1 }
  0xdf   :  { %v523_v42 = vmul.f32 %v1193_v34, %v261_v40  ;;  %v555_v43 = vmul.f32 %v1193_v34, %v389_v41  ;;  %v868_v44 = vpop.f32.mrb[2].mxu0  ;;  %v900_v45 = vpop.f32.mrb[2].mxu1 }
  0xe0   :  { %v596_v46 = vadd.f32 %v1198_v36, %v525_v38  ;;  %v628_v47 = vadd.f32 %v1198_v36, %v557_v39  ;;  %v526_v48 = vmul.f32 %v868_v44, %v1193_v34  ;;  %v558_v49 = vmul.f32 %v900_v45, %v1193_v34  ;;  %v264_v50 = vpop.f32.mrb[3].mxu0  ;;  %v392_v51 = vpop.f32.mrb[3].mxu1 }
  0xe1   :  { %v594_v52 = vadd.f32 %v1198_v36, %v523_v42  ;;  %v626_v53 = vadd.f32 %v1198_v36, %v555_v43  ;;  %v524_v54 = vmul.f32 %v1193_v34, %v264_v50  ;;  %v556_v55 = vmul.f32 %v1193_v34, %v392_v51 }
  0xe2   :  { %v660_v56 = vmax.f32 %v596_v46, 0.0  ;;  %v692_v57 = vmax.f32 %v628_v47, 0.0  ;;  %v597_v58 = vadd.f32 %v1198_v36, %v526_v48  ;;  %v629_v59 = vadd.f32 %v1198_v36, %v558_v49 }
  0xe3   :  { %v658_v60 = vmax.f32 %v594_v52, 0.0  ;;  %v690_v61 = vmax.f32 %v626_v53, 0.0  ;;  %v595_v62 = vadd.f32 %v1198_v36, %v524_v54  ;;  %v627_v63 = vadd.f32 %v1198_v36, %v556_v55 }
  0xe4   :  { %725 = vst.msk [vmem:[%s1588_s4 + $0x10] sm:$0xff] %vm722_vm1, %v660_v56  ;;  %757 = vst.msk [vmem:[%s1588_s4 + $0x110] sm:$0xff] %vm722_vm1, %v692_v57  ;;  %v661_v0 = vmax.f32 %v597_v58, 0.0  ;;  %v693_v1 = vmax.f32 %v629_v59, 0.0 }
  0xe5   :  { %723 = vst.msk [vmem:[%s1588_s4] sm:$0xff] %vm722_vm1, %v658_v60  ;;  %755 = vst.msk [vmem:[%s1588_s4 + $0x100] sm:$0xff] %vm722_vm1, %v690_v61  ;;  %v659_v2 = vmax.f32 %v595_v62, 0.0  ;;  %v691_v3 = vmax.f32 %v627_v63, 0.0  ;;  %v871_v4 = vpop.f32.mrb[4].mxu0  ;;  %v903_v5 = vpop.f32.mrb[4].mxu1 }
  0xe6   :  { %726 = vst.msk [vmem:[%s1588_s4 + $0x18] sm:$0xff] %vm722_vm1, %v661_v0  ;;  %758 = vst.msk [vmem:[%s1588_s4 + $0x118] sm:$0xff] %vm722_vm1, %v693_v1  ;;  %v529_v6 = vmul.f32 %v871_v4, %v1193_v34  ;;  %v561_v7 = vmul.f32 %v903_v5, %v1193_v34  ;;  %v277_v8 = vpop.f32.mrb[5].mxu0  ;;  %v405_v9 = vpop.f32.mrb[5].mxu1 }
  0xe7   :  { %724 = vst.msk [vmem:[%s1588_s4 + $0x8] sm:$0xff] %vm722_vm1, %v659_v2  ;;  %756 = vst.msk [vmem:[%s1588_s4 + $0x108] sm:$0xff] %vm722_vm1, %v691_v3  ;;  %v527_v10 = vmul.f32 %v1193_v34, %v277_v8  ;;  %v559_v11 = vmul.f32 %v1193_v34, %v405_v9  ;;  %v872_v12 = vpop.f32.mrb[6].mxu0  ;;  %v904_v13 = vpop.f32.mrb[6].mxu1 }
  0xe8   :  { %v600_v14 = vadd.f32 %v1198_v36, %v529_v6  ;;  %v632_v15 = vadd.f32 %v1198_v36, %v561_v7  ;;  %v530_v16 = vmul.f32 %v872_v12, %v1193_v34  ;;  %v562_v17 = vmul.f32 %v904_v13, %v1193_v34  ;;  %v280_v18 = vpop.f32.mrb[7].mxu0  ;;  %v408_v19 = vpop.f32.mrb[7].mxu1 }
  0xe9   :  { %v598_v20 = vadd.f32 %v1198_v36, %v527_v10  ;;  %v630_v21 = vadd.f32 %v1198_v36, %v559_v11  ;;  %v528_v22 = vmul.f32 %v1193_v34, %v280_v18  ;;  %v560_v23 = vmul.f32 %v1193_v34, %v408_v19 }
  0xea   :  { %v664_v24 = vmax.f32 %v600_v14, 0.0  ;;  %v696_v25 = vmax.f32 %v632_v15, 0.0  ;;  %v601_v26 = vadd.f32 %v1198_v36, %v530_v16  ;;  %v633_v27 = vadd.f32 %v1198_v36, %v562_v17 }
  0xeb   :  { %v662_v28 = vmax.f32 %v598_v20, 0.0  ;;  %v694_v29 = vmax.f32 %v630_v21, 0.0  ;;  %v599_v30 = vadd.f32 %v1198_v36, %v528_v22  ;;  %v631_v31 = vadd.f32 %v1198_v36, %v560_v23 }
  0xec   :  { %729 = vst.msk [vmem:[%s1588_s4 + $0x30] sm:$0xff] %vm722_vm1, %v664_v24  ;;  %761 = vst.msk [vmem:[%s1588_s4 + $0x130] sm:$0xff] %vm722_vm1, %v696_v25  ;;  %v665_v32 = vmax.f32 %v601_v26, 0.0  ;;  %v697_v33 = vmax.f32 %v633_v27, 0.0 }
  0xed   :  { %727 = vst.msk [vmem:[%s1588_s4 + $0x20] sm:$0xff] %vm722_vm1, %v662_v28  ;;  %759 = vst.msk [vmem:[%s1588_s4 + $0x120] sm:$0xff] %vm722_vm1, %v694_v29  ;;  %v663_v35 = vmax.f32 %v599_v30, 0.0  ;;  %v695_v37 = vmax.f32 %v631_v31, 0.0  ;;  %v875_v38 = vpop.f32.mrb[8].mxu0  ;;  %v907_v39 = vpop.f32.mrb[8].mxu1 }
  0xee   :  { %730 = vst.msk [vmem:[%s1588_s4 + $0x38] sm:$0xff] %vm722_vm1, %v665_v32  ;;  %762 = vst.msk [vmem:[%s1588_s4 + $0x138] sm:$0xff] %vm722_vm1, %v697_v33  ;;  %v533_v40 = vmul.f32 %v875_v38, %v1193_v34  ;;  %v565_v41 = vmul.f32 %v907_v39, %v1193_v34  ;;  %v293_v42 = vpop.f32.mrb[9].mxu0  ;;  %v421_v43 = vpop.f32.mrb[9].mxu1 }
  0xef   :  { %728 = vst.msk [vmem:[%s1588_s4 + $0x28] sm:$0xff] %vm722_vm1, %v663_v35  ;;  %760 = vst.msk [vmem:[%s1588_s4 + $0x128] sm:$0xff] %vm722_vm1, %v695_v37  ;;  %v531_v44 = vmul.f32 %v1193_v34, %v293_v42  ;;  %v563_v45 = vmul.f32 %v1193_v34, %v421_v43  ;;  %v876_v46 = vpop.f32.mrb[10].mxu0  ;;  %v908_v47 = vpop.f32.mrb[10].mxu1 }
  0xf0   :  { %v604_v48 = vadd.f32 %v1198_v36, %v533_v40  ;;  %v636_v49 = vadd.f32 %v1198_v36, %v565_v41  ;;  %v534_v50 = vmul.f32 %v876_v46, %v1193_v34  ;;  %v566_v51 = vmul.f32 %v908_v47, %v1193_v34  ;;  %v296_v52 = vpop.f32.mrb[11].mxu0  ;;  %v424_v53 = vpop.f32.mrb[11].mxu1 }
  0xf1   :  { %v602_v54 = vadd.f32 %v1198_v36, %v531_v44  ;;  %v634_v55 = vadd.f32 %v1198_v36, %v563_v45  ;;  %v532_v56 = vmul.f32 %v1193_v34, %v296_v52  ;;  %v564_v57 = vmul.f32 %v1193_v34, %v424_v53 }
  0xf2   :  { %v668_v58 = vmax.f32 %v604_v48, 0.0  ;;  %v700_v59 = vmax.f32 %v636_v49, 0.0  ;;  %v605_v60 = vadd.f32 %v1198_v36, %v534_v50  ;;  %v637_v61 = vadd.f32 %v1198_v36, %v566_v51 }
  0xf3   :  { %v666_v62 = vmax.f32 %v602_v54, 0.0  ;;  %v698_v63 = vmax.f32 %v634_v55, 0.0  ;;  %v603_v0 = vadd.f32 %v1198_v36, %v532_v56  ;;  %v635_v1 = vadd.f32 %v1198_v36, %v564_v57 }
  0xf4   :  { %733 = vst.msk [vmem:[%s1588_s4 + $0x50] sm:$0xff] %vm722_vm1, %v668_v58  ;;  %765 = vst.msk [vmem:[%s1588_s4 + $0x150] sm:$0xff] %vm722_vm1, %v700_v59  ;;  %v669_v2 = vmax.f32 %v605_v60, 0.0  ;;  %v701_v3 = vmax.f32 %v637_v61, 0.0 }
  0xf5   :  { %731 = vst.msk [vmem:[%s1588_s4 + $0x40] sm:$0xff] %vm722_vm1, %v666_v62  ;;  %763 = vst.msk [vmem:[%s1588_s4 + $0x140] sm:$0xff] %vm722_vm1, %v698_v63  ;;  %v667_v4 = vmax.f32 %v603_v0, 0.0  ;;  %v699_v5 = vmax.f32 %v635_v1, 0.0  ;;  %v879_v6 = vpop.f32.mrb[12].mxu0  ;;  %v911_v7 = vpop.f32.mrb[12].mxu1 }
  0xf6   :  { %734 = vst.msk [vmem:[%s1588_s4 + $0x58] sm:$0xff] %vm722_vm1, %v669_v2  ;;  %766 = vst.msk [vmem:[%s1588_s4 + $0x158] sm:$0xff] %vm722_vm1, %v701_v3  ;;  %v537_v8 = vmul.f32 %v879_v6, %v1193_v34  ;;  %v569_v9 = vmul.f32 %v911_v7, %v1193_v34  ;;  %v309_v10 = vpop.f32.mrb[13].mxu0  ;;  %v437_v11 = vpop.f32.mrb[13].mxu1 }
  0xf7   :  { %732 = vst.msk [vmem:[%s1588_s4 + $0x48] sm:$0xff] %vm722_vm1, %v667_v4  ;;  %764 = vst.msk [vmem:[%s1588_s4 + $0x148] sm:$0xff] %vm722_vm1, %v699_v5  ;;  %v535_v12 = vmul.f32 %v1193_v34, %v309_v10  ;;  %v567_v13 = vmul.f32 %v1193_v34, %v437_v11  ;;  %v880_v14 = vpop.f32.mrb[14].mxu0  ;;  %v912_v15 = vpop.f32.mrb[14].mxu1 }
  0xf8   :  { %v608_v16 = vadd.f32 %v1198_v36, %v537_v8  ;;  %v640_v17 = vadd.f32 %v1198_v36, %v569_v9  ;;  %v538_v18 = vmul.f32 %v880_v14, %v1193_v34  ;;  %v570_v19 = vmul.f32 %v912_v15, %v1193_v34  ;;  %v312_v20 = vpop.f32.mrb[15].mxu0  ;;  %v440_v21 = vpop.f32.mrb[15].mxu1 }
  0xf9   :  { %v606_v22 = vadd.f32 %v1198_v36, %v535_v12  ;;  %v638_v23 = vadd.f32 %v1198_v36, %v567_v13  ;;  %v536_v24 = vmul.f32 %v1193_v34, %v312_v20  ;;  %v568_v25 = vmul.f32 %v1193_v34, %v440_v21 }
  0xfa   :  { %v672_v26 = vmax.f32 %v608_v16, 0.0  ;;  %v704_v27 = vmax.f32 %v640_v17, 0.0  ;;  %v609_v28 = vadd.f32 %v1198_v36, %v538_v18  ;;  %v641_v29 = vadd.f32 %v1198_v36, %v570_v19 }
  0xfb   :  { %v670_v30 = vmax.f32 %v606_v22, 0.0  ;;  %v702_v31 = vmax.f32 %v638_v23, 0.0  ;;  %v607_v32 = vadd.f32 %v1198_v36, %v536_v24  ;;  %v639_v33 = vadd.f32 %v1198_v36, %v568_v25 }
  0xfc   :  { %737 = vst.msk [vmem:[%s1588_s4 + $0x70] sm:$0xff] %vm722_vm1, %v672_v26  ;;  %769 = vst.msk [vmem:[%s1588_s4 + $0x170] sm:$0xff] %vm722_vm1, %v704_v27  ;;  %v673_v35 = vmax.f32 %v609_v28, 0.0  ;;  %v705_v37 = vmax.f32 %v641_v29, 0.0 }
  0xfd   :  { %735 = vst.msk [vmem:[%s1588_s4 + $0x60] sm:$0xff] %vm722_vm1, %v670_v30  ;;  %767 = vst.msk [vmem:[%s1588_s4 + $0x160] sm:$0xff] %vm722_vm1, %v702_v31  ;;  %v671_v38 = vmax.f32 %v607_v32, 0.0  ;;  %v703_v39 = vmax.f32 %v639_v33, 0.0  ;;  %v883_v40 = vpop.f32.mrb[16].mxu0  ;;  %v915_v41 = vpop.f32.mrb[16].mxu1 }
  0xfe   :  { %738 = vst.msk [vmem:[%s1588_s4 + $0x78] sm:$0xff] %vm722_vm1, %v673_v35  ;;  %770 = vst.msk [vmem:[%s1588_s4 + $0x178] sm:$0xff] %vm722_vm1, %v705_v37  ;;  %v541_v42 = vmul.f32 %v883_v40, %v1193_v34  ;;  %v573_v43 = vmul.f32 %v915_v41, %v1193_v34  ;;  %v325_v44 = vpop.f32.mrb[17].mxu0  ;;  %v453_v45 = vpop.f32.mrb[17].mxu1 }
  0xff   :  { %736 = vst.msk [vmem:[%s1588_s4 + $0x68] sm:$0xff] %vm722_vm1, %v671_v38  ;;  %768 = vst.msk [vmem:[%s1588_s4 + $0x168] sm:$0xff] %vm722_vm1, %v703_v39  ;;  %v539_v46 = vmul.f32 %v1193_v34, %v325_v44  ;;  %v571_v47 = vmul.f32 %v1193_v34, %v453_v45  ;;  %v884_v48 = vpop.f32.mrb[18].mxu0  ;;  %v916_v49 = vpop.f32.mrb[18].mxu1 }
 0x100   :  { %v612_v50 = vadd.f32 %v1198_v36, %v541_v42  ;;  %v644_v51 = vadd.f32 %v1198_v36, %v573_v43  ;;  %v542_v52 = vmul.f32 %v884_v48, %v1193_v34  ;;  %v574_v53 = vmul.f32 %v916_v49, %v1193_v34  ;;  %v328_v54 = vpop.f32.mrb[19].mxu0  ;;  %v456_v55 = vpop.f32.mrb[19].mxu1 }
 0x101   :  { %v610_v56 = vadd.f32 %v1198_v36, %v539_v46  ;;  %v642_v57 = vadd.f32 %v1198_v36, %v571_v47  ;;  %v540_v58 = vmul.f32 %v1193_v34, %v328_v54  ;;  %v572_v59 = vmul.f32 %v1193_v34, %v456_v55 }
 0x102   :  { %v676_v60 = vmax.f32 %v612_v50, 0.0  ;;  %v708_v61 = vmax.f32 %v644_v51, 0.0  ;;  %v613_v62 = vadd.f32 %v1198_v36, %v542_v52  ;;  %v645_v63 = vadd.f32 %v1198_v36, %v574_v53 }
 0x103   :  { %v674_v0 = vmax.f32 %v610_v56, 0.0  ;;  %v706_v1 = vmax.f32 %v642_v57, 0.0  ;;  %v611_v2 = vadd.f32 %v1198_v36, %v540_v58  ;;  %v643_v3 = vadd.f32 %v1198_v36, %v572_v59 }
 0x104   :  { %741 = vst.msk [vmem:[%s1588_s4 + $0x90] sm:$0xff] %vm722_vm1, %v676_v60  ;;  %773 = vst.msk [vmem:[%s1588_s4 + $0x190] sm:$0xff] %vm722_vm1, %v708_v61  ;;  %v677_v4 = vmax.f32 %v613_v62, 0.0  ;;  %v709_v5 = vmax.f32 %v645_v63, 0.0 }
 0x105   :  { %739 = vst.msk [vmem:[%s1588_s4 + $0x80] sm:$0xff] %vm722_vm1, %v674_v0  ;;  %771 = vst.msk [vmem:[%s1588_s4 + $0x180] sm:$0xff] %vm722_vm1, %v706_v1  ;;  %v675_v6 = vmax.f32 %v611_v2, 0.0  ;;  %v707_v7 = vmax.f32 %v643_v3, 0.0  ;;  %v887_v8 = vpop.f32.mrb[20].mxu0  ;;  %v919_v9 = vpop.f32.mrb[20].mxu1 }
 0x106   :  { %742 = vst.msk [vmem:[%s1588_s4 + $0x98] sm:$0xff] %vm722_vm1, %v677_v4  ;;  %774 = vst.msk [vmem:[%s1588_s4 + $0x198] sm:$0xff] %vm722_vm1, %v709_v5  ;;  %v545_v10 = vmul.f32 %v887_v8, %v1193_v34  ;;  %v577_v11 = vmul.f32 %v919_v9, %v1193_v34  ;;  %v341_v12 = vpop.f32.mrb[21].mxu0  ;;  %v469_v13 = vpop.f32.mrb[21].mxu1 }
 0x107   :  { %740 = vst.msk [vmem:[%s1588_s4 + $0x88] sm:$0xff] %vm722_vm1, %v675_v6  ;;  %772 = vst.msk [vmem:[%s1588_s4 + $0x188] sm:$0xff] %vm722_vm1, %v707_v7  ;;  %v543_v14 = vmul.f32 %v1193_v34, %v341_v12  ;;  %v575_v15 = vmul.f32 %v1193_v34, %v469_v13  ;;  %v888_v16 = vpop.f32.mrb[22].mxu0  ;;  %v920_v17 = vpop.f32.mrb[22].mxu1 }
 0x108   :  { %v616_v18 = vadd.f32 %v1198_v36, %v545_v10  ;;  %v648_v19 = vadd.f32 %v1198_v36, %v577_v11  ;;  %v546_v20 = vmul.f32 %v888_v16, %v1193_v34  ;;  %v578_v21 = vmul.f32 %v920_v17, %v1193_v34  ;;  %v344_v22 = vpop.f32.mrb[23].mxu0  ;;  %v472_v23 = vpop.f32.mrb[23].mxu1 }
 0x109   :  { %v614_v24 = vadd.f32 %v1198_v36, %v543_v14  ;;  %v646_v25 = vadd.f32 %v1198_v36, %v575_v15  ;;  %v544_v26 = vmul.f32 %v1193_v34, %v344_v22  ;;  %v576_v27 = vmul.f32 %v1193_v34, %v472_v23 }
 0x10a   :  { %v680_v28 = vmax.f32 %v616_v18, 0.0  ;;  %v712_v29 = vmax.f32 %v648_v19, 0.0  ;;  %v617_v30 = vadd.f32 %v1198_v36, %v546_v20  ;;  %v649_v31 = vadd.f32 %v1198_v36, %v578_v21 }
 0x10b   :  { %v678_v32 = vmax.f32 %v614_v24, 0.0  ;;  %v710_v33 = vmax.f32 %v646_v25, 0.0  ;;  %v615_v35 = vadd.f32 %v1198_v36, %v544_v26  ;;  %v647_v37 = vadd.f32 %v1198_v36, %v576_v27 }
 0x10c   :  { %745 = vst.msk [vmem:[%s1588_s4 + $0xb0] sm:$0xff] %vm722_vm1, %v680_v28  ;;  %777 = vst.msk [vmem:[%s1588_s4 + $0x1b0] sm:$0xff] %vm722_vm1, %v712_v29  ;;  %v681_v38 = vmax.f32 %v617_v30, 0.0  ;;  %v713_v39 = vmax.f32 %v649_v31, 0.0 }
 0x10d   :  { %743 = vst.msk [vmem:[%s1588_s4 + $0xa0] sm:$0xff] %vm722_vm1, %v678_v32  ;;  %775 = vst.msk [vmem:[%s1588_s4 + $0x1a0] sm:$0xff] %vm722_vm1, %v710_v33  ;;  %v679_v40 = vmax.f32 %v615_v35, 0.0  ;;  %v711_v41 = vmax.f32 %v647_v37, 0.0  ;;  %v891_v42 = vpop.f32.mrb[24].mxu0  ;;  %v923_v43 = vpop.f32.mrb[24].mxu1 }
 0x10e   :  { %746 = vst.msk [vmem:[%s1588_s4 + $0xb8] sm:$0xff] %vm722_vm1, %v681_v38  ;;  %778 = vst.msk [vmem:[%s1588_s4 + $0x1b8] sm:$0xff] %vm722_vm1, %v713_v39  ;;  %v549_v44 = vmul.f32 %v891_v42, %v1193_v34  ;;  %v581_v45 = vmul.f32 %v923_v43, %v1193_v34  ;;  %v357_v46 = vpop.f32.mrb[25].mxu0  ;;  %v485_v47 = vpop.f32.mrb[25].mxu1 }
 0x10f   :  { %744 = vst.msk [vmem:[%s1588_s4 + $0xa8] sm:$0xff] %vm722_vm1, %v679_v40  ;;  %776 = vst.msk [vmem:[%s1588_s4 + $0x1a8] sm:$0xff] %vm722_vm1, %v711_v41  ;;  %v547_v48 = vmul.f32 %v1193_v34, %v357_v46  ;;  %v579_v49 = vmul.f32 %v1193_v34, %v485_v47  ;;  %v892_v50 = vpop.f32.mrb[26].mxu0  ;;  %v924_v51 = vpop.f32.mrb[26].mxu1 }
 0x110   :  { %v620_v52 = vadd.f32 %v1198_v36, %v549_v44  ;;  %v652_v53 = vadd.f32 %v1198_v36, %v581_v45  ;;  %v550_v54 = vmul.f32 %v892_v50, %v1193_v34  ;;  %v582_v55 = vmul.f32 %v924_v51, %v1193_v34  ;;  %v360_v56 = vpop.f32.mrb[27].mxu0  ;;  %v488_v57 = vpop.f32.mrb[27].mxu1 }
 0x111   :  { %v618_v58 = vadd.f32 %v1198_v36, %v547_v48  ;;  %v650_v59 = vadd.f32 %v1198_v36, %v579_v49  ;;  %v548_v60 = vmul.f32 %v1193_v34, %v360_v56  ;;  %v580_v61 = vmul.f32 %v1193_v34, %v488_v57 }
 0x112   :  { %v684_v62 = vmax.f32 %v620_v52, 0.0  ;;  %v716_v63 = vmax.f32 %v652_v53, 0.0  ;;  %v621_v0 = vadd.f32 %v1198_v36, %v550_v54  ;;  %v653_v1 = vadd.f32 %v1198_v36, %v582_v55 }
 0x113   :  { %v682_v2 = vmax.f32 %v618_v58, 0.0  ;;  %v714_v3 = vmax.f32 %v650_v59, 0.0  ;;  %v619_v4 = vadd.f32 %v1198_v36, %v548_v60  ;;  %v651_v5 = vadd.f32 %v1198_v36, %v580_v61 }
 0x114   :  { %749 = vst.msk [vmem:[%s1588_s4 + $0xd0] sm:$0xff] %vm722_vm1, %v684_v62  ;;  %781 = vst.msk [vmem:[%s1588_s4 + $0x1d0] sm:$0xff] %vm722_vm1, %v716_v63  ;;  %v685_v6 = vmax.f32 %v621_v0, 0.0  ;;  %v717_v7 = vmax.f32 %v653_v1, 0.0 }
 0x115   :  { %747 = vst.msk [vmem:[%s1588_s4 + $0xc0] sm:$0xff] %vm722_vm1, %v682_v2  ;;  %779 = vst.msk [vmem:[%s1588_s4 + $0x1c0] sm:$0xff] %vm722_vm1, %v714_v3  ;;  %v683_v8 = vmax.f32 %v619_v4, 0.0  ;;  %v715_v9 = vmax.f32 %v651_v5, 0.0  ;;  %v895_v10 = vpop.f32.mrb[28].mxu0  ;;  %v927_v11 = vpop.f32.mrb[28].mxu1 }
 0x116   :  { %750 = vst.msk [vmem:[%s1588_s4 + $0xd8] sm:$0xff] %vm722_vm1, %v685_v6  ;;  %782 = vst.msk [vmem:[%s1588_s4 + $0x1d8] sm:$0xff] %vm722_vm1, %v717_v7  ;;  %v553_v12 = vmul.f32 %v895_v10, %v1193_v34  ;;  %v585_v13 = vmul.f32 %v927_v11, %v1193_v34  ;;  %v373_v14 = vpop.f32.mrb[29].mxu0  ;;  %v501_v15 = vpop.f32.mrb[29].mxu1 }
 0x117   :  { %748 = vst.msk [vmem:[%s1588_s4 + $0xc8] sm:$0xff] %vm722_vm1, %v683_v8  ;;  %780 = vst.msk [vmem:[%s1588_s4 + $0x1c8] sm:$0xff] %vm722_vm1, %v715_v9  ;;  %v551_v16 = vmul.f32 %v1193_v34, %v373_v14  ;;  %v583_v17 = vmul.f32 %v1193_v34, %v501_v15  ;;  %v896_v18 = vpop.f32.mrb[30].mxu0  ;;  %v928_v19 = vpop.f32.mrb[30].mxu1 }
 0x118   :  { %v624_v20 = vadd.f32 %v1198_v36, %v553_v12  ;;  %v656_v21 = vadd.f32 %v1198_v36, %v585_v13  ;;  %v554_v22 = vmul.f32 %v896_v18, %v1193_v34  ;;  %v586_v23 = vmul.f32 %v928_v19, %v1193_v34  ;;  %v376_v24 = vpop.f32.mrb[31].mxu0  ;;  %v504_v25 = vpop.f32.mrb[31].mxu1 }
 0x119   :  { %v622_v26 = vadd.f32 %v1198_v36, %v551_v16  ;;  %v654_v27 = vadd.f32 %v1198_v36, %v583_v17  ;;  %v552_v28 = vmul.f32 %v1193_v34, %v376_v24  ;;  %v584_v29 = vmul.f32 %v1193_v34, %v504_v25 }
 0x11a   :  { %v688_v30 = vmax.f32 %v624_v20, 0.0  ;;  %v720_v31 = vmax.f32 %v656_v21, 0.0  ;;  %v625_v32 = vadd.f32 %v1198_v36, %v554_v22  ;;  %v657_v33 = vadd.f32 %v1198_v36, %v586_v23 }
 0x11b   :  { %v686_v35 = vmax.f32 %v622_v26, 0.0  ;;  %v718_v37 = vmax.f32 %v654_v27, 0.0  ;;  %v623_v38 = vadd.f32 %v1198_v36, %v552_v28  ;;  %v655_v39 = vadd.f32 %v1198_v36, %v584_v29 }
 0x11c   :  { %753 = vst.msk [vmem:[%s1588_s4 + $0xf0] sm:$0xff] %vm722_vm1, %v688_v30  ;;  %785 = vst.msk [vmem:[%s1588_s4 + $0x1f0] sm:$0xff] %vm722_vm1, %v720_v31  ;;  %v689_v34 = vmax.f32 %v625_v32, 0.0  ;;  %v721_v40 = vmax.f32 %v657_v33, 0.0 }
 0x11d   :  { %751 = vst.msk [vmem:[%s1588_s4 + $0xe0] sm:$0xff] %vm722_vm1, %v686_v35  ;;  %783 = vst.msk [vmem:[%s1588_s4 + $0x1e0] sm:$0xff] %vm722_vm1, %v718_v37  ;;  %v687_v36 = vmax.f32 %v623_v38, 0.0  ;;  %v719_v41 = vmax.f32 %v655_v39, 0.0 }
 0x11e   :  { %754 = vst.msk [vmem:[%s1588_s4 + $0xf8] sm:$0xff] %vm722_vm1, %v689_v34  ;;  %786 = vst.msk [vmem:[%s1588_s4 + $0x1f8] sm:$0xff] %vm722_vm1, %v721_v40 }
 0x11f   :  { %752 = vst.msk [vmem:[%s1588_s4 + $0xe8] sm:$0xff] %vm722_vm1, %v687_v36  ;;  %784 = vst.msk [vmem:[%s1588_s4 + $0x1e8] sm:$0xff] %vm722_vm1, %v719_v41 }

</bundles_post_ra>
